<compile_context>
chip_gen: v7x
topology: tpu7x:2x2x1
jax: 0.10.0
libtpu: 0.0.40
codegen_flags: <defaults>
</compile_context>

<pallas_src>
import functools

import jax
import jax.numpy as jnp
from jax.experimental import pallas as pl
from jax.experimental.pallas import tpu as pltpu

COEF = 0.97  # same default as the PyTorch module's flipped_filter = [-coef, 1.0]


def _preemphasis_kernel(x_ref, o_ref, carry_ref, *, coef):
    t = pl.program_id(1)          # time-tile index (innermost, sequential)
    x = x_ref[...]                # (tb, tt) tile

    # "Previous sample" for lane 0 of this tile:
    #   first time tile  -> reflect-pad value x[:, 1]
    #   later time tiles -> last column of the previous tile (carried in VMEM scratch)
    first_prev = jnp.where(t == 0, x[:, 1:2], carry_ref[...])     # (tb, 1)
    # Save this tile's last column for the next time tile of the same batch tile.
    carry_ref[...] = x[:, -1:]

    # prev[:, j] = x[:, j-1] within the tile (column 0 wraps; patched below).
    prev = pltpu.roll(x, shift=1, axis=1)     # XLU op, off the VALU/DMA critical path

    # Main compute: y = x - coef * prev, full lane-dense store.
    o_ref[...] = x - coef * prev
    # Patch only column 0 (single-column masked store; negligible).
    o_ref[:, 0:1] = x[:, 0:1] - coef * first_prev


def _choose_tiles(B: int, T: int, itemsize: int, budget_bytes: int):
    """Pick (tb, tt) by a per-block byte budget: lane-dense time tiles first, then batch."""
    lane_q = 128
    sub_q = {4: 8, 2: 16, 1: 32}.get(itemsize, 8)
    b_pad = -(-B // sub_q) * sub_q
    t_pad = -(-T // lane_q) * lane_q
    target_elems = max(budget_bytes // itemsize, sub_q * lane_q)

    # Prefer long, lane-contiguous time tiles; spend leftover budget on batch rows.
    tt = min(t_pad, max(lane_q, (target_elems // sub_q) // lane_q * lane_q))
    tb = min(b_pad, max(sub_q, (target_elems // tt) // sub_q * sub_q))

    # v7x megacore: keep >= 2 batch tiles when possible so the "parallel" batch axis
    # spans both TensorCores (harmless on single-TC v5e/v6e; blocks stay small anyway).
    if b_pad >= 2 * sub_q:
        tb = min(tb, max(sub_q, (b_pad // 2) // sub_q * sub_q))
    return tb, tt


def pre_emphasis(x: jax.Array, coef: float = COEF, *,
                 block_budget_bytes: int = 4 << 20) -> jax.Array:
    """Pallas equivalent of PreEmphasis.forward. x: (B, T) float -> (B, T)."""
    B, T = x.shape
    if T < 2:
        raise ValueError("PreEmphasis requires T >= 2 (reflect pad of width 1).")
    itemsize = jnp.dtype(x.dtype).itemsize

    tb, tt = _choose_tiles(B, T, itemsize, block_budget_bytes)
    grid = (pl.cdiv(B, tb), pl.cdiv(T, tt))
    block_bytes = tb * tt * itemsize

    kernel = functools.partial(_preemphasis_kernel, coef=coef)
    return pl.pallas_call(
        kernel,
        out_shape=jax.ShapeDtypeStruct((B, T), x.dtype),
        grid_spec=pltpu.PrefetchScalarGridSpec(
            num_scalar_prefetch=0,
            grid=grid,
            in_specs=[pl.BlockSpec((tb, tt), lambda b, t: (b, t))],
            out_specs=pl.BlockSpec((tb, tt), lambda b, t: (b, t)),
            scratch_shapes=[pltpu.VMEM((tb, 1), x.dtype)],  # carried t-1 column
        ),
        compiler_params=pltpu.CompilerParams(
            dimension_semantics=("parallel", "arbitrary"),
            # in+out double-buffered blocks (4x block_bytes) + headroom; explicit so the
            # larger default blocks also fit v5e's 16 MiB scoped-VMEM default.
            vmem_limit_bytes=int(min(48 << 20, max(32 << 20, 5 * block_bytes))),
        ),
        cost_estimate=pl.CostEstimate(
            flops=2 * B * T,
            bytes_accessed=2 * B * T * itemsize,
            transcendentals=0,
        ),
    )(x)


def _reference(x: jnp.ndarray, coef: float = COEF) -> jnp.ndarray:
    # Pure-JAX reference mirroring F.pad(..., 'reflect') + conv1d([-coef, 1.0]).
    padded = jnp.concatenate([x[:, 1:2], x], axis=1)  # reflect pad left by 1
    return -coef * padded[:, :-1] + padded[:, 1:]


if __name__ == "__main__":
    key = jax.random.PRNGKey(0)
    k0, k1 = jax.random.split(key)

    # Non-multiple shape (B % 8 != 0, T % 128 != 0): exercises cdiv partial blocks.
    B, T = 2, 1000
    x = jax.random.normal(k0, (B, T), dtype=jnp.float32)
    ref = _reference(x)

    out = jax.block_until_ready(pre_emphasis(x))
    assert out.shape == (B, T)
    assert jnp.allclose(out, ref, atol=1e-6, rtol=1e-6), "mismatch (default budget)"

    # Tiny per-block budget: forces multiple time tiles + a partial last time tile,
    # exercising the carried boundary column across tiles and the clipped writeback.
    out_tiled = jax.block_until_ready(pre_emphasis(x, block_budget_bytes=8 * 256 * 4))
    assert jnp.allclose(out_tiled, ref, atol=1e-6, rtol=1e-6), "mismatch (tiled time axis)"

    # Aligned shape, default budget (single big lane-dense tile).
    x2 = jax.random.normal(k1, (8, 2048), dtype=jnp.float32)
    out2 = jax.block_until_ready(pre_emphasis(x2))
    assert jnp.allclose(out2, _reference(x2), atol=1e-6, rtol=1e-6), "mismatch (aligned shape)"

    print("KERNEL_OK")
</pallas_src>

<mosaic_0001>
module attributes {stable_mosaic.version = 11 : i64} {
  func.func @_preemphasis_kernel(%arg0: i32, %arg1: i32, %arg2: memref<8x1024xf32, #tpu.memory_space<vmem>>, %arg3: memref<8x1024xf32, #tpu.memory_space<vmem>>, %arg4: memref<8x1xf32, #tpu.memory_space<vmem>>) attributes {dimension_semantics = [#tpu.dimension_semantics<parallel>, #tpu.dimension_semantics<arbitrary>], iteration_bounds = array<i64: 1, 1>, scalar_prefetch = 0 : i64, scratch_operands = 1 : i64, tpu.core_type = #tpu.core_type<tc>, window_params = [{transform_indices = @transform_0, window_bounds = array<i64: 8, 1024>}, {transform_indices = @transform_1, window_bounds = array<i64: 8, 1024>}]} {
    %c0 = arith.constant 0 : index
    %c0_0 = arith.constant 0 : index
    %0 = vector.load %arg2[%c0, %c0_0] : memref<8x1024xf32, #tpu.memory_space<vmem>>, vector<8x1024xf32>
    %c0_i32 = arith.constant 0 : i32
    %1 = arith.cmpi eq, %arg1, %c0_i32 : i32
    %2 = vector.extract_strided_slice %0 {offsets = [0, 1], sizes = [8, 1], strides = [1, 1]} : vector<8x1024xf32> to vector<8x1xf32>
    %c0_1 = arith.constant 0 : index
    %c0_2 = arith.constant 0 : index
    %3 = vector.load %arg4[%c0_1, %c0_2] : memref<8x1xf32, #tpu.memory_space<vmem>>, vector<8x1xf32>
    %4 = arith.select %1, %2, %3 : vector<8x1xf32>
    %5 = vector.extract_strided_slice %0 {offsets = [0, 1023], sizes = [8, 1], strides = [1, 1]} : vector<8x1024xf32> to vector<8x1xf32>
    %c0_3 = arith.constant 0 : index
    %c0_4 = arith.constant 0 : index
    %6 = vector.load %arg4[%c0_3, %c0_4] : memref<8x1xf32, #tpu.memory_space<vmem>>, vector<8x1xf32>
    tpu.vector_store %arg4[%c0_3, %c0_4], %5 {strides = array<i32>} : memref<8x1xf32, #tpu.memory_space<vmem>>, vector<8x1xf32>,
    %c1_i32 = arith.constant 1 : i32
    %7 = tpu.dynamic_rotate %0 by %c1_i32 dim 1 : vector<8x1024xf32>, i32 -> vector<8x1024xf32>
    %cst = arith.constant 9.700000e-01 : f32
    %8 = vector.broadcast %cst : f32 to vector<8x1024xf32>
    %9 = arith.mulf %8, %7 : vector<8x1024xf32>
    %10 = arith.subf %0, %9 : vector<8x1024xf32>
    %c0_5 = arith.constant 0 : index
    %c0_6 = arith.constant 0 : index
    %11 = vector.load %arg3[%c0_5, %c0_6] : memref<8x1024xf32, #tpu.memory_space<vmem>>, vector<8x1024xf32>
    tpu.vector_store %arg3[%c0_5, %c0_6], %10 {strides = array<i32>} : memref<8x1024xf32, #tpu.memory_space<vmem>>, vector<8x1024xf32>,
    %12 = vector.extract_strided_slice %0 {offsets = [0, 0], sizes = [8, 1], strides = [1, 1]} : vector<8x1024xf32> to vector<8x1xf32>
    %cst_7 = arith.constant 9.700000e-01 : f32
    %13 = vector.broadcast %cst_7 : f32 to vector<8x1xf32>
    %14 = arith.mulf %13, %4 : vector<8x1xf32>
    %15 = arith.subf %12, %14 : vector<8x1xf32>
    %c0_8 = arith.constant 0 : index
    %c0_9 = arith.constant 0 : index
    %16 = vector.load %arg3[%c0_8, %c0_9] : memref<8x1024xf32, #tpu.memory_space<vmem>>, vector<8x1xf32>
    tpu.vector_store %arg3[%c0_8, %c0_9], %15 {strides = array<i32>} : memref<8x1024xf32, #tpu.memory_space<vmem>>, vector<8x1xf32>,
    return
  }
  func.func @transform_0(%arg0: i32, %arg1: i32) -> (i32, i32) {
    %c0_i32 = arith.constant 0 : i32
    return %arg0, %arg1 : i32, i32
  }
  func.func @transform_1(%arg0: i32, %arg1: i32) -> (i32, i32) {
    %c0_i32 = arith.constant 0 : i32
    return %arg0, %arg1 : i32, i32
  }
}

</mosaic_0001>

<bundles_post_ra>
// kernel: tpu_custom_call.1
= control target key start
LH: loop header
LB: loop body
LE: loop exit
PB: predicated region body
PF: predicated region fallthrough
CT: control target
= control target key end

     0   :  { %6 = vsyncpa [#allocation4], 0  ;;  %s536_s0 = inlined_call_operand.hbm [shape: f32[2,1000], index: 0, kind: input, shape index: {}]   ;;  %s537_s1 = inlined_call_operand.hbm [shape: f32[2,1000], index: 1, kind: output, shape index: {}]  }
   0x1   :  { %7 = vsyncpa [#allocation5], 0 }
   0x2   :  { %12 = vsyncadd [#allocation4], 768  ;;  %s411_s6 = smov [#allocation3]   ;;  %s363_s10 = scalar_lea.hbm %s536_s0, 256 }
   0x3   :  { %s13_s7 = sshll.u32 %s411_s6, 4  ;;  %p364_p0 = scmp.ne.s32.totalorder %s536_s0, %s363_s10  ;;  %s14_s7 = int_to_ptr.vmem [resolvable:$true] %s13_s7 }
   0x4   :  { %p367_p1 = scmp.lt.u32.totalorder %s363_s10, %s536_s0 }
   0x6   :  { %p369_p2 = pnand %p367_p1, %p364_p0 }
   0x8   :  { %372 = shalt.err (!%p369_p2)
}
   0x9   :  { %s373_s15 = scalar_lea.vmem %s14_s7, 256  ;;  %s377_s16 = scalar_lea.vmem %s14_s7, 1024 }
   0xa   :  { %p374_p3 = scmp.ne.s32.totalorder %s14_s7, %s373_s15  ;;  %p378_p4 = scmp.lt.s32.totalorder %s14_s7, %s14_s7 }
   0xb   :  { %p379_p5 = scmp.lt.s32.totalorder %s377_s16, %s373_s15 }
   0xd   :  { %p380_p6 = por %p379_p5, %p378_p4 }
   0xf   :  { %p381_p7 = pnand %p380_p6, %p374_p3 }
  0x11   :  { %384 = shalt.err (!%p381_p7)
}
  0x12   :  { %s412_s17 = smov 256   ;;  %s413_s18 = smov 16  }
  0x13   :  { %19 = dma.hbm_to_vmem [thread:$0]  %s536_s0, 256, %s14_s7, [#allocation4], %s412_s17, %s412_s17, %s413_s18  }
  0x14   :  { %407 = dma.done.wait [#allocation4], 1024  }
  0x15   :  { %408 = vsyncadd [#allocation4], 4294966272  ;;  %v41_v0 = vlaneseq  ;;  %v414_v1 = vmov 1983009808   ;;  %v445_v6 = vld [vmem:[#allocation3] sm:$0xff]  ;;  %v447_v7 = vld [vmem:[#allocation3 + $0x10] sm:$0xff] }
  0x16   :  { %v39_v2 = vunpack.c.l.s4 %v414_v1  ;;  %v449_v8 = vld [vmem:[#allocation3 + $0x20] sm:$0xff]  ;;  %v451_v9 = vld [vmem:[#allocation3 + $0x30] sm:$0xff]  ;;  %v101_v10 = vcombine.high %v445_v6, %v447_v7  ;;  %v100_v11 = vcombine.low %v445_v6, %v447_v7  ;;  %v457_v12 = vld [vmem:[#allocation3 + $0x8] sm:$0xff]  ;;  %s415_s0 = smov 1   ;;  %v302_v38 = vmul.f32 0.97, %v445_v6 }
  0x17   :  { %v42_v3 = vshrl.u32 %v41_v0, 7  ;;  %v459_v13 = vld [vmem:[#allocation3 + $0x18] sm:$0xff]  ;;  %v103_v14 = vcombine.high %v449_v8, %v451_v9  ;;  %v102_v15 = vcombine.low %v449_v8, %v451_v9  ;;  %v465_v16 = vld [vmem:[#allocation3 + $0x28] sm:$0xff]  ;;  %v303_v39 = vmul.f32 0.97, %v447_v7  ;;  %s416_s21 = smov 127  }
  0x18   :  { %v40_v4 = vunpack.c.0.s8 %v39_v2  ;;  %v467_v17 = vld [vmem:[#allocation3 + $0x38] sm:$0xff]  ;;  %v136_v18 = vcombine.low %v457_v12, %v459_v13  ;;  %v74_v22 = vcombine.high %v457_v12, %v459_v13  ;;  %v304_v40 = vmul.f32 0.97, %v449_v8 }
  0x19   :  { %v137_v21 = vcombine.low %v465_v16, %v467_v17  ;;  %v75_v25 = vcombine.high %v465_v16, %v467_v17  ;;  %v305_v41 = vmul.f32 0.97, %v451_v9  ;;  %v180_v42 = vand.u32 127, %v41_v0 }
  0x1a   :  { %v443_v5 = vsub.s32 %v40_v4, %v42_v3  ;;  %vm326_vm1 = vcmask 1024  }
  0x1b   :  { %vm181_vm0 = vcmp.lt.s32.totalorder %v180_v42, 1 }
  0x1c   :  { %v117_v19 = vrot.slane %v101_v10, %v443_v5  ;;  %v110_v20 = vrot.slane %v100_v11, %v443_v5  ;;  %v131_v23 = vrot.slane %v103_v14, %v443_v5  ;;  %v124_v24 = vrot.slane %v102_v15, %v443_v5 }
  0x1d   :  { %v144_v28 = vrot.slane %v136_v18, %v443_v5  ;;  %v151_v29 = vrot.slane %v137_v21, %v443_v5  ;;  %v82_v30 = vrot.slane %v74_v22, %v443_v5  ;;  %v89_v33 = vrot.slane %v75_v25, %v443_v5 }
  0x1e   :  { %v134_v26 = vcombine.low %v117_v19, %v131_v23  ;;  %v132_v27 = vcombine.low %v110_v20, %v124_v24  ;;  %v135_v31 = vcombine.high %v117_v19, %v131_v23  ;;  %v133_v32 = vcombine.high %v110_v20, %v124_v24 }
  0x1f   :  { %v152_v34 = vcombine.low %v144_v28, %v151_v29  ;;  %v90_v35 = vcombine.high %v82_v30, %v89_v33  ;;  %v154_v36 = vcombine.low %v82_v30, %v89_v33  ;;  %v153_v37 = vcombine.high %v144_v28, %v151_v29 }
  0x20   :  { %167 = vrot.lane.b32.xlu1 %v134_v26, %s415_s0  ;;  %163 = vrot.lane.b32.xlu0 %v132_v27, %s415_s0 }
  0x24   :  { %169 = vrot.lane.b32.xlu1 %v135_v31, %s415_s0  ;;  %165 = vrot.lane.b32.xlu0 %v133_v32, %s415_s0 }
  0x28   :  { %171 = vrot.lane.b32.xlu1 %v152_v34, %s415_s0  ;;  %177 = vrot.lane.b32.xlu0 %v90_v35, %s415_s0 }
  0x2c   :  { %175 = vrot.lane.b32.xlu1 %v154_v36, %s415_s0  ;;  %173 = vrot.lane.b32.xlu0 %v153_v37, %s415_s0 }
  0x30   :  { %310 = vrot.lane.b32.xlu0 %v302_v38, %s416_s21  ;;  %312 = vrot.lane.b32.xlu1 %v303_v39, %s416_s21 }
  0x34   :  { %314 = vrot.lane.b32.xlu0 %v304_v40, %s416_s21  ;;  %316 = vrot.lane.b32.xlu1 %v305_v41, %s416_s21 }
  0x38   :  { %91 = vrot.lane.b32.xlu0 %v90_v35, %s415_s0 }
  0x92   :  { %v168_v43 = vpop.permute.xlu1 %167  ;;  %v164_v44 = vpop.permute.xlu0 %163 }
  0x96   :  { %v170_v45 = vpop.permute.xlu1 %169  ;;  %v166_v46 = vpop.permute.xlu0 %165 }
  0x97   :  { %v186_v47 = vsel %vm181_vm0, %v168_v43, %v170_v45  ;;  %v187_v48 = vsel %vm181_vm0, %v166_v46, %v168_v43  ;;  %v188_v51 = vsel %vm181_vm0, %v164_v44, %v166_v46 }
  0x98   :  { %v193_v49 = vmul.f32 0.97, %v186_v47  ;;  %v192_v50 = vmul.f32 0.97, %v187_v48  ;;  %v191_v57 = vmul.f32 0.97, %v188_v51 }
  0x9a   :  { %v208_v52 = vcombine.low %v192_v50, %v193_v49  ;;  %v172_v53 = vpop.permute.xlu1 %171  ;;  %v178_v54 = vpop.permute.xlu0 %177  ;;  %v209_v55 = vcombine.high %v192_v50, %v193_v49 }
  0x9b   :  { %v189_v56 = vsel %vm181_vm0, %v178_v54, %v164_v44  ;;  %v185_v60 = vsel %vm181_vm0, %v170_v45, %v172_v53 }
  0x9c   :  { %v190_v58 = vmul.f32 0.97, %v189_v56  ;;  %v230_v59 = vrot.slane %v208_v52, %v443_v5  ;;  %v237_v1 = vrot.slane %v209_v55, %v443_v5  ;;  %v194_v18 = vmul.f32 0.97, %v185_v60 }
  0x9e   :  { %v206_v61 = vcombine.low %v190_v58, %v191_v57  ;;  %v207_v62 = vcombine.high %v190_v58, %v191_v57  ;;  %v176_v63 = vpop.permute.xlu1 %175  ;;  %v174_v0 = vpop.permute.xlu0 %173 }
  0x9f   :  { %v182_v2 = vsel %vm181_vm0, %v176_v63, %v178_v54  ;;  %v183_v3 = vsel %vm181_vm0, %v174_v0, %v176_v63  ;;  %v184_v4 = vsel %vm181_vm0, %v172_v53, %v174_v0 }
  0xa0   :  { %v216_v10 = vrot.slane %v206_v61, %v443_v5  ;;  %v223_v11 = vrot.slane %v207_v62, %v443_v5  ;;  %v197_v14 = vmul.f32 0.97, %v182_v2  ;;  %v195_v15 = vmul.f32 0.97, %v184_v4 }
  0xa1   :  { %v196_v19 = vmul.f32 0.97, %v183_v3 }
  0xa2   :  { %v238_v20 = vcombine.low %v216_v10, %v230_v59  ;;  %v239_v21 = vcombine.high %v216_v10, %v230_v59  ;;  %v240_v22 = vcombine.low %v223_v11, %v237_v1  ;;  %v241_v23 = vcombine.high %v223_v11, %v237_v1  ;;  %v311_v24 = vpop.permute.xlu0 %310  ;;  %v313_v25 = vpop.permute.xlu1 %312 }
  0xa3   :  { %v242_v26 = vcombine.low %v194_v18, %v195_v15  ;;  %v243_v27 = vcombine.high %v194_v18, %v195_v15  ;;  %v244_v28 = vcombine.low %v196_v19, %v197_v14  ;;  %v245_v29 = vcombine.high %v196_v19, %v197_v14 }
  0xa4   :  { %v286_v30 = vsub.f32 %v445_v6, %v238_v20  ;;  %v288_v31 = vsub.f32 %v447_v7, %v239_v21  ;;  %v290_v32 = vsub.f32 %v449_v8, %v240_v22  ;;  %v292_v33 = vsub.f32 %v451_v9, %v241_v23 }
  0xa5   :  { %v252_v34 = vrot.slane %v242_v26, %v443_v5  ;;  %v259_v35 = vrot.slane %v243_v27, %v443_v5  ;;  %v266_v36 = vrot.slane %v244_v28, %v443_v5  ;;  %v273_v37 = vrot.slane %v245_v29, %v443_v5 }
  0xa6   :  { %294 = vst [vmem:[#allocation6] sm:$0xff] %v286_v30  ;;  %296 = vst [vmem:[#allocation6 + $0x10] sm:$0xff] %v288_v31  ;;  %v322_v38 = vsub.f32 %v445_v6, %v311_v24  ;;  %v323_v39 = vsub.f32 %v447_v7, %v313_v25  ;;  %v315_v40 = vpop.permute.xlu0 %314  ;;  %v317_v41 = vpop.permute.xlu1 %316 }
  0xa7   :  { %298 = vst [vmem:[#allocation6 + $0x20] sm:$0xff] %v290_v32  ;;  %300 = vst [vmem:[#allocation6 + $0x30] sm:$0xff] %v292_v33  ;;  %v274_v42 = vcombine.low %v252_v34, %v266_v36  ;;  %v275_v43 = vcombine.high %v252_v34, %v266_v36  ;;  %v276_v44 = vcombine.low %v259_v35, %v273_v37 }
  0xa8   :  { %v277_v45 = vcombine.high %v259_v35, %v273_v37  ;;  %327 = vst.msk [vmem:[#allocation6] sm:$0x3] %vm326_vm1, %v322_v38  ;;  %328 = vst.msk [vmem:[#allocation6 + $0x10] sm:$0x3] %vm326_vm1, %v323_v39  ;;  %v324_v5 = vsub.f32 %v449_v8, %v315_v40  ;;  %v325_v46 = vsub.f32 %v451_v9, %v317_v41 }
  0xa9   :  { %v287_v47 = vsub.f32 %v457_v12, %v274_v42  ;;  %v289_v6 = vsub.f32 %v459_v13, %v275_v43  ;;  %v291_v7 = vsub.f32 %v465_v16, %v276_v44 }
  0xaa   :  { %v293_v48 = vsub.f32 %v467_v17, %v277_v45  ;;  %329 = vst.msk [vmem:[#allocation6 + $0x20] sm:$0x3] %vm326_vm1, %v324_v5  ;;  %330 = vst.msk [vmem:[#allocation6 + $0x30] sm:$0x3] %vm326_vm1, %v325_v46  ;;  %v92_v49 = vpop.permute.xlu0 %91 }
  0xab   :  { %295 = vst [vmem:[#allocation6 + $0x8] sm:$0xff] %v287_v47  ;;  %297 = vst [vmem:[#allocation6 + $0x18] sm:$0xff] %v289_v6 }
  0xac   :  { %299 = vst [vmem:[#allocation6 + $0x28] sm:$0xff] %v291_v7  ;;  %301 = vst [vmem:[#allocation6 + $0x38] sm:$0xff] %v293_v48 }
  0xad   :  { %335 = vsyncadd [#allocation5], 768  ;;  %s417_s22 = smov [#allocation6]  }
  0xae   :  { %s336_s23 = sshll.u32 %s417_s22, 4  ;;  %s337_s23 = int_to_ptr.vmem [resolvable:$true] %s336_s23 }
  0xaf   :  { %s385_s24 = scalar_lea.vmem %s337_s23, 256  ;;  %s389_s25 = scalar_lea.vmem %s337_s23, 1024 }
  0xb0   :  { %p386_p8 = scmp.ne.s32.totalorder %s337_s23, %s385_s24  ;;  %p390_p9 = scmp.lt.s32.totalorder %s337_s23, %s337_s23 }
  0xb1   :  { %p391_p10 = scmp.lt.s32.totalorder %s389_s25, %s385_s24 }
  0xb3   :  { %p392_p11 = por %p391_p10, %p390_p9 }
  0xb5   :  { %p393_p12 = pnand %p392_p11, %p386_p8 }
  0xb7   :  { %396 = shalt.err (!%p393_p12)
}
  0xb8   :  { %s397_s28 = scalar_lea.hbm %s537_s1, 256 }
  0xb9   :  { %p398_p13 = scmp.ne.s32.totalorder %s537_s1, %s397_s28  ;;  %p401_p0 = scmp.lt.u32.totalorder %s397_s28, %s537_s1 }
  0xbb   :  { %p403_p1 = pnand %p401_p0, %p398_p13 }
  0xbd   :  { %406 = shalt.err (!%p403_p1)
}
  0xbe   :  { %342 = dma.vmem_to_hbm [thread:$0]  %s337_s23, 256, %s537_s1, [#allocation5], %s412_s17, %s412_s17, %s413_s18  }
  0xbf   :  { %409 = dma.done.wait [#allocation5], 1024  }
  0xc0   :  { %410 = vsyncadd [#allocation5], 4294966272 }
  0xc1   :  { %346 = vsyncpa [#allocation4], 1 }
  0xc2   :  { %347 = vsyncpa [#allocation5], 1 }

</bundles_post_ra>
